<compile_context>
chip_gen: v5e
topology: v5e:2x2
jax: 0.10.0
libtpu: 0.0.40
codegen_flags: <defaults>
</compile_context>

<pallas_src>
import math
import functools

import jax
import jax.numpy as jnp
import numpy as np
from jax.experimental import pallas as pl
from jax.experimental.pallas import tpu as pltpu

_NEG = -1e30                      # finite "-inf" so no inf/nan arithmetic
_VMEM_LIMIT = 32 * 1024 * 1024    # safe scoped-VMEM request on v5e/v6e/v7x


def _pick_tile(n, candidates):
    for t in candidates:
        if t <= n and n % t == 0:
            return t
    return n


# ---------------------------------------------------------------------------
# qkv projection (head-major output) with fused RoPE on q/k heads.
#   x:[S,Din] @ w_hm:[3H,Din,Dh] + b_hm:[3H,1,Dh] -> [3H,S,Dh]
# ---------------------------------------------------------------------------
def _qkv_rope_kernel(cos_ref, sin_ref, x_ref, w_ref, b_ref, o_ref, acc_ref, *,
                     num_heads, half):
    g = pl.program_id(0)
    ki = pl.program_id(2)

    @pl.when(ki == 0)
    def _():
        acc_ref[...] = jnp.zeros(acc_ref.shape, acc_ref.dtype)

    acc_ref[...] += jnp.dot(x_ref[...], w_ref[0],
                            preferred_element_type=jnp.float32)

    last = ki == pl.num_programs(2) - 1
    is_qk = g < 2 * num_heads

    @pl.when(jnp.logical_and(last, is_qk))
    def _():
        r = acc_ref[...] + b_ref[0]
        cos = cos_ref[...]
        sin = sin_ref[...]
        r1 = r[:, :half]
        r2 = r[:, half:]
        # TODO(synk): a pltpu.roll-based rotate-half would avoid the lane concat.
        rot = jnp.concatenate([r1 * cos - r2 * sin, r2 * cos + r1 * sin],
                              axis=-1)
        o_ref[0] = rot.astype(o_ref.dtype)

    @pl.when(jnp.logical_and(last, jnp.logical_not(is_qk)))
    def _():
        o_ref[0] = (acc_ref[...] + b_ref[0]).astype(o_ref.dtype)


def pallas_qkv_rope(x, w_hm, b_hm, cos_half, sin_half, num_heads):
    S, Din = x.shape
    G, _, Dh = w_hm.shape            # G = 3*H
    half = Dh // 2
    tm = _pick_tile(S, (256, 128, 64, 32, 16, 8))
    tk = _pick_tile(Din, (512, 256, 128, 64, 32, 16, 8))
    kernel = functools.partial(_qkv_rope_kernel, num_heads=num_heads, half=half)
    return pl.pallas_call(
        kernel,
        out_shape=jax.ShapeDtypeStruct((G, S, Dh), x.dtype),
        grid=(G, S // tm, Din // tk),
        in_specs=[
            pl.BlockSpec((tm, half), lambda g, mi, ki: (mi, 0)),       # cos
            pl.BlockSpec((tm, half), lambda g, mi, ki: (mi, 0)),       # sin
            pl.BlockSpec((tm, tk), lambda g, mi, ki: (mi, ki)),        # x
            pl.BlockSpec((1, tk, Dh), lambda g, mi, ki: (g, ki, 0)),   # w
            pl.BlockSpec((1, 1, Dh), lambda g, mi, ki: (g, 0, 0)),     # b
        ],
        out_specs=pl.BlockSpec((1, tm, Dh), lambda g, mi, ki: (g, mi, 0)),
        scratch_shapes=[pltpu.VMEM((tm, Dh), jnp.float32)],
        compiler_params=pltpu.CompilerParams(
            dimension_semantics=("parallel", "parallel", "arbitrary"),
            vmem_limit_bytes=_VMEM_LIMIT),
    )(cos_half, sin_half, x, w_hm, b_hm)


# ---------------------------------------------------------------------------
# Tiled flash attention with block-diagonal (varlen) masking & tile skipping.
# qkv_hm: [3H, S, Dh]; heads 0..H-1 = q, H..2H-1 = k, 2H..3H-1 = v.
# ---------------------------------------------------------------------------
def _flash_attn_kernel(seg_smem, segq_ref, segk_ref, q_ref, k_ref, v_ref,
                       o_ref, m_sc, l_sc, acc_sc, *, scale, tq, tkv):
    qi = pl.program_id(1)
    kv = pl.program_id(2)

    @pl.when(kv == 0)
    def _():
        m_sc[...] = jnp.full(m_sc.shape, _NEG, m_sc.dtype)
        l_sc[...] = jnp.zeros(l_sc.shape, l_sc.dtype)
        acc_sc[...] = jnp.zeros(acc_sc.shape, acc_sc.dtype)

    # Segment ids are non-decreasing: tile segment ranges come from the tile
    # boundary rows (scalar SMEM reads).  Skip fully-masked (disjoint) tiles.
    q_lo = seg_smem[qi * tq]
    q_hi = seg_smem[qi * tq + tq - 1]
    k_lo = seg_smem[kv * tkv]
    k_hi = seg_smem[kv * tkv + tkv - 1]
    intersects = jnp.logical_and(k_lo <= q_hi, k_hi >= q_lo)

    @pl.when(intersects)
    def _():
        q = q_ref[0]                       # (tq, Dh)
        k = k_ref[0]                       # (tkv, Dh)
        v = v_ref[0]                       # (tkv, Dh)
        s = jax.lax.dot_general(
            q, k, (((1,), (1,)), ((), ())),
            preferred_element_type=jnp.float32) * scale        # (tq, tkv)
        mask = segq_ref[...] == segk_ref[...]                  # (tq,1)==(1,tkv)
        s = jnp.where(mask, s, _NEG)

        m_prev = m_sc[...]
        m_new = jnp.maximum(m_prev, jnp.max(s, axis=-1, keepdims=True))
        alpha = jnp.exp(m_prev - m_new)
        p = jnp.where(mask, jnp.exp(s - m_new), 0.0)           # 0 on masked
        l_sc[...] = alpha * l_sc[...] + jnp.sum(p, axis=-1, keepdims=True)
        acc_sc[...] = alpha * acc_sc[...] + jnp.dot(
            p.astype(v.dtype), v, preferred_element_type=jnp.float32)
        m_sc[...] = m_new

    @pl.when(kv == pl.num_programs(2) - 1)
    def _():
        o_ref[0] = (acc_sc[...] *
                    pl.reciprocal(l_sc[...], approx=True)).astype(o_ref.dtype)


def pallas_flash_varlen_attention(qkv_hm, seg_ids, num_heads):
    G, S, Dh = qkv_hm.shape
    H = num_heads
    scale = 1.0 / math.sqrt(Dh)
    tq = _pick_tile(S, (256, 128, 64, 32, 16, 8))
    tkv = _pick_tile(S, (512, 256, 128, 64, 32, 16, 8))
    seg_col = seg_ids.reshape(S, 1)      # q-row view
    seg_row = seg_ids.reshape(1, S)      # kv-col (lane-dense) view

    kernel = functools.partial(_flash_attn_kernel, scale=scale, tq=tq, tkv=tkv)
    grid_spec = pltpu.PrefetchScalarGridSpec(
        num_scalar_prefetch=1,           # seg_ids -> SMEM for tile skipping
        grid=(H, S // tq, S // tkv),
        in_specs=[
            pl.BlockSpec((tq, 1), lambda h, qi, kv, seg: (qi, 0)),
            pl.BlockSpec((1, tkv), lambda h, qi, kv, seg: (0, kv)),
            pl.BlockSpec((1, tq, Dh), lambda h, qi, kv, seg: (h, qi, 0)),
            pl.BlockSpec((1, tkv, Dh), lambda h, qi, kv, seg: (H + h, kv, 0)),
            pl.BlockSpec((1, tkv, Dh),
                         lambda h, qi, kv, seg: (2 * H + h, kv, 0)),
        ],
        out_specs=pl.BlockSpec((1, tq, Dh), lambda h, qi, kv, seg: (h, qi, 0)),
        scratch_shapes=[
            pltpu.VMEM((tq, 1), jnp.float32),   # running max
            pltpu.VMEM((tq, 1), jnp.float32),   # running denom
            pltpu.VMEM((tq, Dh), jnp.float32),  # running numerator
        ],
    )
    return pl.pallas_call(
        kernel,
        out_shape=jax.ShapeDtypeStruct((H, S, Dh), qkv_hm.dtype),
        grid_spec=grid_spec,
        compiler_params=pltpu.CompilerParams(
            dimension_semantics=("parallel", "parallel", "arbitrary"),
            vmem_limit_bytes=_VMEM_LIMIT),
    )(seg_ids, seg_col, seg_row, qkv_hm, qkv_hm, qkv_hm)


# ---------------------------------------------------------------------------
# Output projection reducing over heads (no transpose of the attention out).
#   out[s,n] = sum_h o[h,s,:] @ w_hm[h,:,n] + b[n]
# ---------------------------------------------------------------------------
def _proj_kernel(x_ref, w_ref, b_ref, o_ref, acc_ref):
    hi = pl.program_id(2)

    @pl.when(hi == 0)
    def _():
        acc_ref[...] = jnp.zeros(acc_ref.shape, acc_ref.dtype)

    acc_ref[...] += jnp.dot(x_ref[0], w_ref[0],
                            preferred_element_type=jnp.float32)

    @pl.when(hi == pl.num_programs(2) - 1)
    def _():
        o_ref[...] = (acc_ref[...] + b_ref[...]).astype(o_ref.dtype)


def pallas_proj(o_hm, w_hm, b2d):
    H, S, Dh = o_hm.shape
    Dout = w_hm.shape[-1]
    tm = _pick_tile(S, (256, 128, 64, 32, 16, 8))
    tn = _pick_tile(Dout, (512, 256, 128, 64, 32, 16, 8))
    return pl.pallas_call(
        _proj_kernel,
        out_shape=jax.ShapeDtypeStruct((S, Dout), o_hm.dtype),
        grid=(S // tm, Dout // tn, H),
        in_specs=[
            pl.BlockSpec((1, tm, Dh), lambda mi, ni, hi: (hi, mi, 0)),
            pl.BlockSpec((1, Dh, tn), lambda mi, ni, hi: (hi, 0, ni)),
            pl.BlockSpec((1, tn), lambda mi, ni, hi: (0, ni)),
        ],
        out_specs=pl.BlockSpec((tm, tn), lambda mi, ni, hi: (mi, ni)),
        scratch_shapes=[pltpu.VMEM((tm, tn), jnp.float32)],
        compiler_params=pltpu.CompilerParams(
            dimension_semantics=("parallel", "parallel", "arbitrary"),
            vmem_limit_bytes=_VMEM_LIMIT),
    )(o_hm, w_hm, b2d)


# ---------------------------------------------------------------------------
# Module wrapper
# ---------------------------------------------------------------------------
class Qwen25VLVisionFlashAttention2Pallas:
    def __init__(self, dim: int, num_heads: int = 16, *, key):
        assert dim % num_heads == 0
        self.dim = dim
        self.num_heads = num_heads
        self.head_dim = dim // num_heads
        k1, k2, k3, k4 = jax.random.split(key, 4)
        scale = 0.02
        # PyTorch nn.Linear layout: weight [out, in]
        self.qkv_w = jax.random.normal(k1, (3 * dim, dim), jnp.float32) * scale
        self.qkv_b = jax.random.normal(k2, (3 * dim,), jnp.float32) * scale
        self.proj_w = jax.random.normal(k3, (dim, dim), jnp.float32) * scale
        self.proj_b = jax.random.normal(k4, (dim,), jnp.float32) * scale

        H, Dh = num_heads, self.head_dim
        # One-time head-major repacks of the weights (no per-call transposes).
        self.qkv_w_hm = jnp.transpose(
            self.qkv_w.reshape(3 * H, Dh, dim), (0, 2, 1))     # [3H, Din, Dh]
        self.qkv_b_hm = self.qkv_b.reshape(3 * H, 1, Dh)
        self.proj_w_hm = self.proj_w.T.reshape(H, Dh, dim)      # [H, Dh, Dout]
        self.proj_b2d = self.proj_b.reshape(1, dim)

    def __call__(self, hidden_states, cu_seqlens, rotary_pos_emb=None,
                 position_embeddings=None):
        S, D = hidden_states.shape
        H, Dh = self.num_heads, self.head_dim

        # cos/sin exactly as apply_rotary_pos_emb_flashatt:
        # emb = cat(rpe, rpe); cos = emb.cos().chunk(2)[0] == cos(rpe)
        if position_embeddings is None:
            cos_half = jnp.cos(rotary_pos_emb).astype(jnp.float32)
            sin_half = jnp.sin(rotary_pos_emb).astype(jnp.float32)
        else:
            cos, sin = position_embeddings
            cos_half = cos[:, : Dh // 2].astype(jnp.float32)
            sin_half = sin[:, : Dh // 2].astype(jnp.float32)

        # varlen flash-attention semantics: block-diagonal segments.
        # (max_seqlen in the PyTorch code only sizes flash-attn tiles.)
        pos = jnp.arange(S, dtype=cu_seqlens.dtype)
        seg_ids = (jnp.searchsorted(cu_seqlens, pos, side="right") - 1
                   ).astype(jnp.int32)

        qkv_hm = pallas_qkv_rope(hidden_states, self.qkv_w_hm, self.qkv_b_hm,
                                 cos_half, sin_half, H)        # [3H, S, Dh]
        o_hm = pallas_flash_varlen_attention(qkv_hm, seg_ids, H)  # [H, S, Dh]
        return pallas_proj(o_hm, self.proj_w_hm, self.proj_b2d)   # [S, D]


# ---------------------------------------------------------------------------
# Pure-JAX reference for correctness checking
# ---------------------------------------------------------------------------
def reference_forward(mod, x, cu_seqlens, rotary_pos_emb):
    S, D = x.shape
    H, Dh = mod.num_heads, mod.head_dim
    qkv = x @ mod.qkv_w.T + mod.qkv_b
    qkv = qkv.reshape(S, 3, H, Dh)
    q, k, v = qkv[:, 0], qkv[:, 1], qkv[:, 2]          # [S, H, Dh]
    cos = jnp.cos(rotary_pos_emb)[:, None, :]
    sin = jnp.sin(rotary_pos_emb)[:, None, :]

    def rope(t):
        t1, t2 = t[..., : Dh // 2], t[..., Dh // 2:]
        return jnp.concatenate([t1 * cos - t2 * sin, t2 * cos + t1 * sin], -1)

    q, k = rope(q), rope(k)
    pos = jnp.arange(S, dtype=cu_seqlens.dtype)
    seg = jnp.searchsorted(cu_seqlens, pos, side="right") - 1
    mask = seg[:, None] == seg[None, :]
    scores = jnp.einsum("shd,thd->hst", q, k) / math.sqrt(Dh)
    scores = jnp.where(mask[None], scores, -jnp.inf)
    p = jax.nn.softmax(scores, axis=-1)
    o = jnp.einsum("hst,thd->shd", p, v).reshape(S, D)
    return o @ mod.proj_w.T + mod.proj_b


if __name__ == "__main__":
    key = jax.random.PRNGKey(0)
    k_param, k_x, k_rope = jax.random.split(key, 3)

    seq_len = 384            # 3 q-tiles x 3 kv-tiles; exercises skip + masking
    num_heads = 4
    head_dim = 32
    dim = num_heads * head_dim          # 128

    mod = Qwen25VLVisionFlashAttention2Pallas(dim, num_heads, key=k_param)

    hidden_states = jax.random.normal(k_x, (seq_len, dim), jnp.float32)
    rotary_pos_emb = jax.random.uniform(
        k_rope, (seq_len, head_dim // 2), jnp.float32, minval=0.0, maxval=3.0)
    # segments not aligned to tiles -> exercises partial masks, fully-masked
    # rows, and fully-disjoint (skipped) tiles.
    cu_seqlens = jnp.array([0, 96, 160, 256, 384], dtype=jnp.int32)

    out = mod(hidden_states, cu_seqlens, rotary_pos_emb=rotary_pos_emb)
    out = jax.block_until_ready(out)

    ref = reference_forward(mod, hidden_states, cu_seqlens, rotary_pos_emb)
    np.testing.assert_allclose(np.asarray(out), np.asarray(ref),
                               atol=2e-3, rtol=2e-3)
    print("KERNEL_OK")
</pallas_src>

<mosaic_0001>
module attributes {stable_mosaic.version = 11 : i64} {
  func.func @_qkv_rope_kernel(%arg0: i32, %arg1: i32, %arg2: i32, %arg3: memref<128x16xf32, #tpu.memory_space<vmem>>, %arg4: memref<128x16xf32, #tpu.memory_space<vmem>>, %arg5: memref<128x128xf32, #tpu.memory_space<vmem>>, %arg6: memref<1x128x32xf32, #tpu.memory_space<vmem>>, %arg7: memref<1x1x32xf32, #tpu.memory_space<vmem>>, %arg8: memref<1x128x32xf32, #tpu.memory_space<vmem>>, %arg9: memref<128x32xf32, #tpu.memory_space<vmem>>) attributes {dimension_semantics = [#tpu.dimension_semantics<parallel>, #tpu.dimension_semantics<parallel>, #tpu.dimension_semantics<arbitrary>], iteration_bounds = array<i64: 12, 3, 1>, scalar_prefetch = 0 : i64, scratch_operands = 1 : i64, tpu.core_type = #tpu.core_type<tc>, window_params = [{transform_indices = @transform_0, window_bounds = array<i64: 128, 16>}, {transform_indices = @transform_1, window_bounds = array<i64: 128, 16>}, {transform_indices = @transform_2, window_bounds = array<i64: 128, 128>}, {transform_indices = @transform_3, window_bounds = array<i64: 1, 128, 32>}, {transform_indices = @transform_4, window_bounds = array<i64: 1, 1, 32>}, {transform_indices = @transform_5, window_bounds = array<i64: 1, 128, 32>}]} {
    %c0_i32 = arith.constant 0 : i32
    %0 = arith.cmpi eq, %arg2, %c0_i32 : i32
    %1 = arith.extui %0 : i1 to i32
    %c0_i32_0 = arith.constant 0 : i32
    %2 = arith.cmpi ne, %1, %c0_i32_0 : i32
    scf.if %2 {
      %cst_12 = arith.constant 0.000000e+00 : f32
      %19 = vector.broadcast %cst_12 : f32 to vector<128x32xf32>
      %c0_13 = arith.constant 0 : index
      %c0_14 = arith.constant 0 : index
      %20 = vector.load %arg9[%c0_13, %c0_14] : memref<128x32xf32, #tpu.memory_space<vmem>>, vector<128x32xf32>
      tpu.vector_store %arg9[%c0_13, %c0_14], %19 {strides = array<i32>} : memref<128x32xf32, #tpu.memory_space<vmem>>, vector<128x32xf32>,
    } else {
    }
    %c0 = arith.constant 0 : index
    %c0_1 = arith.constant 0 : index
    %3 = vector.load %arg9[%c0, %c0_1] : memref<128x32xf32, #tpu.memory_space<vmem>>, vector<128x32xf32>
    %c0_2 = arith.constant 0 : index
    %c0_3 = arith.constant 0 : index
    %4 = vector.load %arg5[%c0_2, %c0_3] : memref<128x128xf32, #tpu.memory_space<vmem>>, vector<128x128xf32>
    %c0_4 = arith.constant 0 : index
    %c0_5 = arith.constant 0 : index
    %c0_6 = arith.constant 0 : index
    %5 = vector.load %arg6[%c0_4, %c0_5, %c0_6] : memref<1x128x32xf32, #tpu.memory_space<vmem>>, vector<1x128x32xf32>
    %6 = vector.shape_cast %5 : vector<1x128x32xf32> to vector<128x32xf32>
    %cst = arith.constant dense<0.000000e+00> : vector<128x32xf32>
    %7 = tpu.matmul %4, %6, %cst {dimension_numbers = #tpu.dot_dimension_numbers<[1], [0], [0], [1], [0, 0, 1, 1], [], []>} : vector<128x128xf32>, vector<128x32xf32>, vector<128x32xf32> -> vector<128x32xf32>
    %8 = arith.addf %3, %7 : vector<128x32xf32>
    %c0_7 = arith.constant 0 : index
    %c0_8 = arith.constant 0 : index
    %9 = vector.load %arg9[%c0_7, %c0_8] : memref<128x32xf32, #tpu.memory_space<vmem>>, vector<128x32xf32>
    tpu.vector_store %arg9[%c0_7, %c0_8], %8 {strides = array<i32>} : memref<128x32xf32, #tpu.memory_space<vmem>>, vector<128x32xf32>,
    %c0_i32_9 = arith.constant 0 : i32
    %10 = arith.cmpi eq, %arg2, %c0_i32_9 : i32
    %c8_i32 = arith.constant 8 : i32
    %11 = arith.cmpi slt, %arg0, %c8_i32 : i32
    %12 = arith.andi %10, %11 : i1
    %13 = arith.extui %12 : i1 to i32
    %c0_i32_10 = arith.constant 0 : i32
    %14 = arith.cmpi ne, %13, %c0_i32_10 : i32
    scf.if %14 {
      %c0_12 = arith.constant 0 : index
      %c0_13 = arith.constant 0 : index
      %19 = vector.load %arg9[%c0_12, %c0_13] : memref<128x32xf32, #tpu.memory_space<vmem>>, vector<128x32xf32>
      %c0_14 = arith.constant 0 : index
      %c0_15 = arith.constant 0 : index
      %c0_16 = arith.constant 0 : index
      %20 = vector.load %arg7[%c0_14, %c0_15, %c0_16] : memref<1x1x32xf32, #tpu.memory_space<vmem>>, vector<1x1x32xf32>
      %21 = vector.shape_cast %20 : vector<1x1x32xf32> to vector<1x32xf32>
      %22 = vector.broadcast %21 : vector<1x32xf32> to vector<128x32xf32>
      %23 = arith.addf %19, %22 : vector<128x32xf32>
      %c0_17 = arith.constant 0 : index
      %c0_18 = arith.constant 0 : index
      %24 = vector.load %arg3[%c0_17, %c0_18] : memref<128x16xf32, #tpu.memory_space<vmem>>, vector<128x16xf32>
      %c0_19 = arith.constant 0 : index
      %c0_20 = arith.constant 0 : index
      %25 = vector.load %arg4[%c0_19, %c0_20] : memref<128x16xf32, #tpu.memory_space<vmem>>, vector<128x16xf32>
      %26 = vector.extract_strided_slice %23 {offsets = [0, 0], sizes = [128, 16], strides = [1, 1]} : vector<128x32xf32> to vector<128x16xf32>
      %27 = vector.extract_strided_slice %23 {offsets = [0, 16], sizes = [128, 16], strides = [1, 1]} : vector<128x32xf32> to vector<128x16xf32>
      %28 = arith.mulf %26, %24 : vector<128x16xf32>
      %29 = arith.mulf %27, %25 : vector<128x16xf32>
      %30 = arith.subf %28, %29 : vector<128x16xf32>
      %31 = arith.mulf %27, %24 : vector<128x16xf32>
      %32 = arith.mulf %26, %25 : vector<128x16xf32>
      %33 = arith.addf %31, %32 : vector<128x16xf32>
      %34 = tpu.concatenate %30, %33 in 1 : vector<128x16xf32>, vector<128x16xf32> -> vector<128x32xf32>
      %c0_21 = arith.constant 0 : index
      %c0_22 = arith.constant 0 : index
      %c0_23 = arith.constant 0 : index
      %35 = vector.load %arg8[%c0_21, %c0_22, %c0_23] : memref<1x128x32xf32, #tpu.memory_space<vmem>>, vector<1x128x32xf32>
      %36 = vector.shape_cast %35 : vector<1x128x32xf32> to vector<128x32xf32>
      %37 = vector.shape_cast %34 : vector<128x32xf32> to vector<1x128x32xf32>
      tpu.vector_store %arg8[%c0_21, %c0_22, %c0_23], %37 {strides = array<i32>} : memref<1x128x32xf32, #tpu.memory_space<vmem>>, vector<1x128x32xf32>,
    } else {
    }
    %true = arith.constant true
    %15 = arith.xori %11, %true : i1
    %16 = arith.andi %10, %15 : i1
    %17 = arith.extui %16 : i1 to i32
    %c0_i32_11 = arith.constant 0 : i32
    %18 = arith.cmpi ne, %17, %c0_i32_11 : i32
    scf.if %18 {
      %c0_12 = arith.constant 0 : index
      %c0_13 = arith.constant 0 : index
      %19 = vector.load %arg9[%c0_12, %c0_13] : memref<128x32xf32, #tpu.memory_space<vmem>>, vector<128x32xf32>
      %c0_14 = arith.constant 0 : index
      %c0_15 = arith.constant 0 : index
      %c0_16 = arith.constant 0 : index
      %20 = vector.load %arg7[%c0_14, %c0_15, %c0_16] : memref<1x1x32xf32, #tpu.memory_space<vmem>>, vector<1x1x32xf32>
      %21 = vector.shape_cast %20 : vector<1x1x32xf32> to vector<1x32xf32>
      %22 = vector.broadcast %21 : vector<1x32xf32> to vector<128x32xf32>
      %23 = arith.addf %19, %22 : vector<128x32xf32>
      %c0_17 = arith.constant 0 : index
      %c0_18 = arith.constant 0 : index
      %c0_19 = arith.constant 0 : index
      %24 = vector.load %arg8[%c0_17, %c0_18, %c0_19] : memref<1x128x32xf32, #tpu.memory_space<vmem>>, vector<1x128x32xf32>
      %25 = vector.shape_cast %24 : vector<1x128x32xf32> to vector<128x32xf32>
      %26 = vector.shape_cast %23 : vector<128x32xf32> to vector<1x128x32xf32>
      tpu.vector_store %arg8[%c0_17, %c0_18, %c0_19], %26 {strides = array<i32>} : memref<1x128x32xf32, #tpu.memory_space<vmem>>, vector<1x128x32xf32>,
    } else {
    }
    return
  }
  func.func @transform_0(%arg0: i32, %arg1: i32, %arg2: i32) -> (i32, i32) {
    %c0_i32 = arith.constant 0 : i32
    %c0_i32_0 = arith.constant 0 : i32
    return %arg1, %c0_i32 : i32, i32
  }
  func.func @transform_1(%arg0: i32, %arg1: i32, %arg2: i32) -> (i32, i32) {
    %c0_i32 = arith.constant 0 : i32
    %c0_i32_0 = arith.constant 0 : i32
    return %arg1, %c0_i32 : i32, i32
  }
  func.func @transform_2(%arg0: i32, %arg1: i32, %arg2: i32) -> (i32, i32) {
    %c0_i32 = arith.constant 0 : i32
    return %arg1, %arg2 : i32, i32
  }
  func.func @transform_3(%arg0: i32, %arg1: i32, %arg2: i32) -> (i32, i32, i32) {
    %c0_i32 = arith.constant 0 : i32
    %c0_i32_0 = arith.constant 0 : i32
    return %arg0, %arg2, %c0_i32 : i32, i32, i32
  }
  func.func @transform_4(%arg0: i32, %arg1: i32, %arg2: i32) -> (i32, i32, i32) {
    %c0_i32 = arith.constant 0 : i32
    %c0_i32_0 = arith.constant 0 : i32
    %c0_i32_1 = arith.constant 0 : i32
    return %arg0, %c0_i32, %c0_i32_0 : i32, i32, i32
  }
  func.func @transform_5(%arg0: i32, %arg1: i32, %arg2: i32) -> (i32, i32, i32) {
    %c0_i32 = arith.constant 0 : i32
    %c0_i32_0 = arith.constant 0 : i32
    return %arg0, %arg1, %c0_i32 : i32, i32, i32
  }
}

</mosaic_0001>

<bundles_post_ra>
// kernel: tpu_custom_call.1
= control target key start
LH: loop header
LB: loop body
LE: loop exit
PB: predicated region body
PF: predicated region fallthrough
CT: control target
= control target key end

     0   :  { %s2374_s0 = inlined_call_operand.vmem [shape: f32[384,16], index: 0, kind: input, shape index: {}]   ;;  %s2375_s1 = inlined_call_operand.vmem [shape: f32[384,16], index: 1, kind: input, shape index: {}]   ;;  %s2376_s2 = inlined_call_operand.hbm [shape: f32[384,128], index: 2, kind: input, shape index: {}]   ;;  %s2377_s3 = inlined_call_operand.vmem [shape: f32[12,128,32], index: 3, kind: input, shape index: {}]   ;;  %s2378_s4 = inlined_call_operand.hbm [shape: f32[12,1,32], index: 4, kind: input, shape index: {}]   ;;  %s2379_s5 = inlined_call_operand.vmem [shape: f32[12,384,32], index: 5, kind: output, shape index: {}]  }
   0x1   :  { %2386 = sst [smem:[#allocation16_spill]] %s2376_s2 }
   0x2   :  { %2387 = sst [smem:[#allocation17_spill]] %s2378_s4 }
   0x3   :  { %2388 = sst [smem:[#allocation18_spill]] %s2379_s5 }
   0x4   :  { %10 = vsyncpa [#allocation4], 0 }
   0x5   :  { %12 = vsyncpa [#allocation4 + $0x1], 0 }
   0x6   :  { %13 = vsyncpa [#allocation6], 0 }
   0x7   :  { %15 = vsyncpa [#allocation6 + $0x1], 0  ;;  %s1611_s18 = smov 0   ;;  %s1613_s19 = smov 0  }
   0x8   :  { %s1615_s20 = smov 0   ;;  %s1617_s21 = smov 0  }
   0x9   :  { %s1619_s22 = smov 0   ;;  %s1621_s23 = smov 0  }
   0xa   :  { %s1623_s24 = smov 0   ;;  %s1625_s25 = smov 0  }
   0xb   :  { %s1627_s26 = smov 0   ;;  %s1629_s27 = smov 0  }
   0xc   :  { %s1631_s28 = smov 0  }
   0xd LB: > { %s36_s29 = sadd.s32 1, %s1566_s26  ;;  %s101_s30 = sadd.s32 1, %s1554_s23  ;;  %s1574_s28 = sphi %s1631_s28, %s21_s28   ;;  %s1570_s27 = sphi %s1629_s27, %s2421_s27   ;;  %s1566_s26 = sphi %s1627_s26, %s2420_s26   ;;  %s1562_s25 = sphi %s1625_s25, %s2419_s25   ;;  %s1558_s24 = sphi %s1623_s24, %s2418_s24   ;;  %s1554_s23 = sphi %s1621_s23, %s2417_s23   ;;  %s1550_s22 = sphi %s1619_s22, %s2416_s22   ;;  %s1546_s21 = sphi %s1617_s21, %s2415_s21   ;;  %s1542_s20 = sphi %s1615_s20, %s2414_s20   ;;  %s1538_s19 = sphi %s1613_s19, %s2413_s19   ;;  %s1534_s18 = sphi %s1611_s18, %s2412_s18  }
   0xe   : > { %p1668_p0 = scmp.ge.s32.totalorder %s36_s29, 3  ;;  %p108_p1 = scmp.ne.s32.totalorder %s1554_s23, %s1550_s22 }
   0xf   : > { %p109_p2 = scmp.eq.s32.totalorder %s1574_s28, 0  ;;  %p114_p3 = scmp.ne.s32.totalorder %s1550_s22, %s1546_s21 }
  0x10   : > { %s2423_s29 = smov (%p1668_p0, %s36_s29), 0  ;;  %p1324_p5 = scmp.lt.s32.totalorder %s1574_s28, 36 }
  0x11   : > { %p1683_p4 = por %p109_p2, %p108_p1  ;;  %s96_s8 = ssub.s32 %s1566_s26, %s2423_s29 }
  0x12   : > { %p99_p6 = scmp.eq.s32.totalorder %s96_s8, 0  ;;  %s238_s9 = sand.u32 1, %s1554_s23  }
  0x13   : > { %s1243_s10 = sshll.u32 %s238_s9, 7  ;;  %s1260_s12 = sshll.u32 %s1566_s26, 7 }
  0x14   : > { %s1692_s11 = scalar_select %p99_p6, %s1554_s23, %s101_s30  }
  0x15   : > { %s2391_s2 = sld [smem:[#allocation16_spill]]  ;;  %s242_s16 = scalar_lea.vmem [#allocation3], %s1243_s10 }
  0x16   : > { %s251_s17 = sshll.u32 %s242_s16, 4  ;;  %p1318_p7 = pnand %p1324_p5, %p1683_p4  ;;  %s252_s17 = int_to_ptr.vmem [resolvable:$true] %s251_s17 }
  0x17   : > { %p1246_p8 = scmp.ge.s32.totalorder %s1574_s28, 1  ;;  %s239_s30 = scalar_lea.sflag [#allocation4], %s238_s9 }
  0x18   : > { %s1576_s8 = smov 128   ;;  %p289_p9 = scmp.lt.s32.totalorder %s1574_s28, 37 }
  0x19   : > { %s1239_s7 = sadd.s32 4294967295, %s1574_s28   ;;  %s40_s13 = sadd.s32 1, %s1570_s27 }
  0x1a   : > { %p1704_p10 = pnand %p1246_p8, %p289_p9  ;;  %s2425_s13 = smov (!%p1668_p0, %s40_s13), %s1570_s27 }
  0x1b   : > { %s248_s15 = scalar_lea.hbm %s2391_s2, %s1260_s12  ;;  %s1577_s12 = smov 8  }
  0x1c   : > { %s249_s5 = sshll.u32 %s248_s15, 4  ;;  %p115_p11 = scmp.eq.s32.totalorder %s1239_s7, 0  ;;  %s250_s5 = int_to_ptr.hbm [resolvable:$true] %s249_s5 }
  0x1d   : > { %1320 = dma.hbm_to_vmem [thread:$0]  (!%p1318_p7), %s250_s5, 2048, %s252_s17, %s239_s30, %s1576_s8, %s1576_s8, %s1577_s12  }
  0x1e   : > { %p42_p12 = scmp.ge.s32.totalorder %s2425_s13, 12  ;;  %p162_p13 = scmp.ne.s32.totalorder %s1542_s20, %s1538_s19 }
  0x1f   : > { %p1718_p1 = por %p115_p11, %p114_p3  ;;  %p168_p4 = scmp.ne.s32.totalorder %s1538_s19, %s1534_s18 }
  0x20   : > { %s2427_s13 = smov (%p42_p12, %s2425_s13), 0  ;;  %s155_s5 = sadd.s32 1, %s1542_s20 }
  0x21   : > { %p1727_p6 = por %p168_p4, %p115_p11  ;;  %s152_s6 = ssub.s32 %s1570_s27, %s2427_s13 }
  0x22   : > { %s274_s15 = sand.u32 1, %s1542_s20   ;;  %p153_p0 = scmp.eq.s32.totalorder %s152_s6, 0 }
  0x23   : > { %p164_p7 = por %p162_p13, %p109_p2  ;;  %s2395_s4 = sld [smem:[#allocation17_spill]] }
  0x24   : > { %s1741_s30 = scalar_select %p153_p0, %s1542_s20, %s155_s5  }
  0x25   : > { %s277_s8 = scalar_lea.vmem [#allocation5], %s274_s15  ;;  %p1321_p3 = pnand %p1324_p5, %p164_p7 }
  0x26   : > { %s284_s12 = sshll.u32 %s277_s8, 4  ;;  %s275_s7 = scalar_lea.sflag [#allocation6], %s274_s15  ;;  %s285_s12 = int_to_ptr.vmem [resolvable:$true] %s284_s12 }
  0x27   : > { %293 = sbr.rel (%p1704_p10) target bundleno = 593 (0x251), region = 40  ;;  %s295_s6 = sand.u32 (!%p1704_p10), 1, %s1550_s22  }
  0x28   : > { %s1247_s2 = sshll.u32 (!%p1704_p10), %s295_s6, 7  ;;  %s296_s21 = scalar_lea.sflag (!%p1704_p10), [#allocation4], %s295_s6 }
  0x29   : > { %s280_s17 = scalar_lea.hbm %s2395_s4, %s1570_s27  ;;  %s1748_s16 = scalar_lea.vmem (!%p1704_p10), [#allocation3], %s1247_s2 }
  0x2a   : > { %s282_s18 = sshll.u32 %s280_s17, 4  ;;  %s283_s18 = int_to_ptr.hbm [resolvable:$true] %s282_s18 }
  0x2b   : > { %1323 = dma.hbm_to_vmem [thread:$0]  (!%p1321_p3), %s283_s18, 16, %s285_s12, %s275_s7  }
  0x2c   : > { %1525 = dma.done.wait (%p1718_p1), %s296_s21, 2048  }
  0x2d   : > { %1527 = vsyncadd (%p1718_p1), %s296_s21, 4294965248  ;;  %s305_s5 = sand.u32 1, %s1538_s19  }
  0x2e   : > { %s306_s15 = scalar_lea.sflag [#allocation6], %s305_s5  ;;  %s1755_s17 = scalar_lea.vmem [#allocation5], %s305_s5 }
  0x2f   : > { %1529 = dma.done.wait (%p1727_p6), %s306_s15, 16  }
  0x30   : > { %1531 = vsyncadd (%p1727_p6), %s306_s15, 4294967280  ;;  %s1248_s2 = sshll.u32 %s1558_s24, 4  ;;  %p377_p2 = scmp.lt.s32.totalorder %s1562_s25, 11  ;;  %vm400_vm0 = vcmask 261120   ;;  %v1578_v15 = vmov 0.0   ;;  %v441_v17 = vld [vmem:[%s1748_s16 + $0x40] sm:$0xff] }
  0x31   : > { %p364_p5 = scmp.lt.s32.totalorder %s1248_s2, 47  ;;  %s2396_s21 = sld [smem:[#allocation18_spill]]  ;;  %401 = vst.msk [vmem:[#allocation2] sm:$0xff] %vm400_vm0, %v1578_v15  ;;  %v445_v18 = vld [vmem:[%s1748_s16 + $0x60] sm:$0xff]  ;;  %v442_v21 = vld [vmem:[%s1748_s16 + $0x48] sm:$0xff]  ;;  %v443_v25 = vld [vmem:[%s1748_s16 + $0x50] sm:$0xff] }
  0x32   : > { %s378_s10 = scalar_select %p377_p2, %s1562_s25, 11  ;;  %402 = vst.msk [vmem:[#allocation2 + $0x8] sm:$0xff] %vm400_vm0, %v1578_v15  ;;  %v433_v19 = vld [vmem:[%s1748_s16] sm:$0xff]  ;;  %v446_v22 = vld [vmem:[%s1748_s16 + $0x68] sm:$0xff]  ;;  %v447_v26 = vld [vmem:[%s1748_s16 + $0x70] sm:$0xff] }
  0x33   : > { %s2429_s2 = smov (!%p364_p5, %s1248_s2), 47  ;;  %403 = vst.msk [vmem:[#allocation2 + $0x10] sm:$0xff] %vm400_vm0, %v1578_v15  ;;  %v437_v20 = vld [vmem:[%s1748_s16 + $0x20] sm:$0xff]  ;;  %v434_v23 = vld [vmem:[%s1748_s16 + $0x8] sm:$0xff]  ;;  %v435_v27 = vld [vmem:[%s1748_s16 + $0x10] sm:$0xff]  ;;  %p563_p8 = scmp.lt.s32.totalorder %s1562_s25, 8 }
  0x34   : > { %s1261_s9 = sshll.u32 %s378_s10, 7  ;;  %s1312_s18 = smul.u32 48, %s378_s10  ;;  %404 = vst.msk [vmem:[#allocation2 + $0x18] sm:$0xff] %vm400_vm0, %v1578_v15  ;;  %v438_v24 = vld [vmem:[%s1748_s16 + $0x28] sm:$0xff]  ;;  %v439_v28 = vld [vmem:[%s1748_s16 + $0x30] sm:$0xff]  ;;  %v444_v29 = vld [vmem:[%s1748_s16 + $0x58] sm:$0xff] }
  0x35   : > { %s1249_s8 = sshll.u32 %s2429_s2, 3  ;;  %s1767_s6 = scalar_lea.vmem %s2377_s3, %s1261_s9  ;;  %405 = vst.msk [vmem:[#allocation2 + $0x20] sm:$0xff] %vm400_vm0, %v1578_v15  ;;  %v448_v30 = vld [vmem:[%s1748_s16 + $0x78] sm:$0xff] }
  0x36   : > { %s1772_s24 = scalar_lea.vmem %s2374_s0, %s1249_s8  ;;  %s1777_s4 = scalar_lea.vmem %s2375_s1, %s1249_s8  ;;  %v464_v0 = vld [vmem:[%s1767_s6 + $0x78] sm:$0xff]  ;;  %v463_v1 = vld [vmem:[%s1767_s6 + $0x70] sm:$0xff]  ;;  %v462_v2 = vld [vmem:[%s1767_s6 + $0x68] sm:$0xff]  ;;  %406 = vst.msk [vmem:[#allocation2 + $0x28] sm:$0xff] %vm400_vm0, %v1578_v15 }
  0x37   : > { %s392_s10 = sadd.s32 %s1312_s18, %s2429_s2  ;;  %1265 = vmatpush.msra.mxu2 %v464_v0  ;;  %1266 = vmatpush.msra.mxu3 %v464_v0  ;;  %v461_v3 = vld [vmem:[%s1767_s6 + $0x60] sm:$0xff]  ;;  %v460_v4 = vld [vmem:[%s1767_s6 + $0x58] sm:$0xff]  ;;  %v459_v5 = vld [vmem:[%s1767_s6 + $0x50] sm:$0xff]  ;;  %407 = vst.msk [vmem:[#allocation2 + $0x30] sm:$0xff] %vm400_vm0, %v1578_v15 }
  0x38   : > { %s1255_s9 = sshll.u32 %s392_s10, 3  ;;  %465 = vmatpush.msra.mxu0 %v464_v0  ;;  %1264 = vmatpush.msra.mxu1 %v464_v0  ;;  %v458_v6 = vld [vmem:[%s1767_s6 + $0x48] sm:$0xff]  ;;  %v457_v7 = vld [vmem:[%s1767_s6 + $0x40] sm:$0xff]  ;;  %v456_v8 = vld [vmem:[%s1767_s6 + $0x38] sm:$0xff]  ;;  %408 = vst.msk [vmem:[#allocation2 + $0x38] sm:$0xff] %vm400_vm0, %v1578_v15 }
  0x39   : > { %s1784_s5 = scalar_lea.vmem %s2396_s21, %s1255_s9  ;;  %1268 = vmatpush.msra.mxu2 %v463_v1  ;;  %1269 = vmatpush.msra.mxu3 %v463_v1  ;;  %v455_v9 = vld [vmem:[%s1767_s6 + $0x30] sm:$0xff]  ;;  %v454_v10 = vld [vmem:[%s1767_s6 + $0x28] sm:$0xff]  ;;  %v453_v11 = vld [vmem:[%s1767_s6 + $0x20] sm:$0xff]  ;;  %409 = vst.msk [vmem:[#allocation2 + $0x40] sm:$0xff] %vm400_vm0, %v1578_v15 }
  0x3a   : > { %466 = vmatpush.msra.mxu0 %v463_v1  ;;  %1267 = vmatpush.msra.mxu1 %v463_v1  ;;  %v452_v12 = vld [vmem:[%s1767_s6 + $0x18] sm:$0xff]  ;;  %v451_v13 = vld [vmem:[%s1767_s6 + $0x10] sm:$0xff]  ;;  %v450_v14 = vld [vmem:[%s1767_s6 + $0x8] sm:$0xff]  ;;  %410 = vst.msk [vmem:[#allocation2 + $0x48] sm:$0xff] %vm400_vm0, %v1578_v15 }
  0x3b   : > { %1271 = vmatpush.msra.mxu2 %v462_v2  ;;  %1272 = vmatpush.msra.mxu3 %v462_v2  ;;  %v449_v16 = vld [vmem:[%s1767_s6] sm:$0xff]  ;;  %411 = vst.msk [vmem:[#allocation2 + $0x50] sm:$0xff] %vm400_vm0, %v1578_v15  ;;  %v436_v31 = vld [vmem:[%s1748_s16 + $0x18] sm:$0xff]  ;;  %v418_v45 = vld [vmem:[#allocation2 + $0x8] sm:$0xff] }
  0x3c   : > { %467 = vmatpush.msra.mxu0 %v462_v2  ;;  %1270 = vmatpush.msra.mxu1 %v462_v2  ;;  %412 = vst.msk [vmem:[#allocation2 + $0x58] sm:$0xff] %vm400_vm0, %v1578_v15  ;;  %v440_v32 = vld [vmem:[%s1748_s16 + $0x38] sm:$0xff]  ;;  %v417_v33 = vld [vmem:[#allocation2] sm:$0xff]  ;;  %v419_v57 = vld [vmem:[#allocation2 + $0x10] sm:$0xff] }
  0x3d   : > { %1274 = vmatpush.msra.mxu2 %v461_v3  ;;  %1275 = vmatpush.msra.mxu3 %v461_v3  ;;  %413 = vst.msk [vmem:[#allocation2 + $0x60] sm:$0xff] %vm400_vm0, %v1578_v15  ;;  %v421_v34 = vld [vmem:[#allocation2 + $0x20] sm:$0xff]  ;;  %v422_v46 = vld [vmem:[#allocation2 + $0x28] sm:$0xff] }
  0x3e   : > { %468 = vmatpush.msra.mxu0 %v461_v3  ;;  %1273 = vmatpush.msra.mxu1 %v461_v3  ;;  %414 = vst.msk [vmem:[#allocation2 + $0x68] sm:$0xff] %vm400_vm0, %v1578_v15  ;;  %v423_v58 = vld [vmem:[#allocation2 + $0x30] sm:$0xff] }
  0x3f   : > { %1277 = vmatpush.msra.mxu2 %v460_v4  ;;  %1278 = vmatpush.msra.mxu3 %v460_v4  ;;  %415 = vst.msk [vmem:[#allocation2 + $0x70] sm:$0xff] %vm400_vm0, %v1578_v15 }
  0x40   : > { %469 = vmatpush.msra.mxu0 %v460_v4  ;;  %1276 = vmatpush.msra.mxu1 %v460_v4  ;;  %416 = vst.msk [vmem:[#allocation2 + $0x78] sm:$0xff] %vm400_vm0, %v1578_v15  ;;  %v425_v39 = vld [vmem:[#allocation2 + $0x40] sm:$0xff] }
  0x41   : > { %1280 = vmatpush.msra.mxu2 %v459_v5  ;;  %1281 = vmatpush.msra.mxu3 %v459_v5  ;;  %v426_v51 = vld [vmem:[#allocation2 + $0x48] sm:$0xff] }
  0x42   : > { %470 = vmatpush.msra.mxu0 %v459_v5  ;;  %1279 = vmatpush.msra.mxu1 %v459_v5  ;;  %v427_v63 = vld [vmem:[#allocation2 + $0x50] sm:$0xff]  ;;  %v420_v5 = vld [vmem:[#allocation2 + $0x18] sm:$0xff] }
  0x43   : > { %1283 = vmatpush.msra.mxu2 %v458_v6  ;;  %1284 = vmatpush.msra.mxu3 %v458_v6 }
  0x44   : > { %471 = vmatpush.msra.mxu0 %v458_v6  ;;  %1282 = vmatpush.msra.mxu1 %v458_v6  ;;  %v429_v40 = vld [vmem:[#allocation2 + $0x60] sm:$0xff]  ;;  %v424_v6 = vld [vmem:[#allocation2 + $0x38] sm:$0xff] }
  0x45   : > { %1286 = vmatpush.msra.mxu2 %v457_v7  ;;  %1287 = vmatpush.msra.mxu3 %v457_v7  ;;  %v430_v52 = vld [vmem:[#allocation2 + $0x68] sm:$0xff] }
  0x46   : > { %472 = vmatpush.msra.mxu0 %v457_v7  ;;  %1285 = vmatpush.msra.mxu1 %v457_v7  ;;  %v431_v0 = vld [vmem:[#allocation2 + $0x70] sm:$0xff] }
  0x47   : > { %1289 = vmatpush.msra.mxu2 %v456_v8  ;;  %1290 = vmatpush.msra.mxu3 %v456_v8 }
  0x48   : > { %473 = vmatpush.msra.mxu0 %v456_v8  ;;  %1288 = vmatpush.msra.mxu1 %v456_v8 }
  0x49   : > { %1292 = vmatpush.msra.mxu2 %v455_v9  ;;  %1293 = vmatpush.msra.mxu3 %v455_v9 }
  0x4a   : > { %474 = vmatpush.msra.mxu0 %v455_v9  ;;  %1291 = vmatpush.msra.mxu1 %v455_v9 }
  0x4b   : > { %1295 = vmatpush.msra.mxu2 %v454_v10  ;;  %1296 = vmatpush.msra.mxu3 %v454_v10 }
  0x4c   : > { %475 = vmatpush.msra.mxu0 %v454_v10  ;;  %1294 = vmatpush.msra.mxu1 %v454_v10 }
  0x4d   : > { %1298 = vmatpush.msra.mxu2 %v453_v11  ;;  %1299 = vmatpush.msra.mxu3 %v453_v11 }
  0x4e   : > { %476 = vmatpush.msra.mxu0 %v453_v11  ;;  %1297 = vmatpush.msra.mxu1 %v453_v11  ;;  %v428_v11 = vld [vmem:[#allocation2 + $0x58] sm:$0xff] }
  0x4f   : > { %1301 = vmatpush.msra.mxu2 %v452_v12  ;;  %1302 = vmatpush.msra.mxu3 %v452_v12 }
  0x50   : > { %477 = vmatpush.msra.mxu0 %v452_v12  ;;  %1300 = vmatpush.msra.mxu1 %v452_v12  ;;  %v432_v12 = vld [vmem:[#allocation2 + $0x78] sm:$0xff] }
  0x51   : > { %1304 = vmatpush.msra.mxu2 %v451_v13  ;;  %1305 = vmatpush.msra.mxu3 %v451_v13 }
  0x52   : > { %478 = vmatpush.msra.mxu0 %v451_v13  ;;  %1303 = vmatpush.msra.mxu1 %v451_v13 }
  0x53   : > { %1307 = vmatpush.msra.mxu2 %v450_v14  ;;  %1308 = vmatpush.msra.mxu3 %v450_v14 }
  0x54   : > { %479 = vmatpush.msra.mxu0 %v450_v14  ;;  %1306 = vmatpush.msra.mxu1 %v450_v14 }
  0x55   : > { %1310 = vmatpush.msra.mxu2 %v449_v16  ;;  %1311 = vmatpush.msra.mxu3 %v449_v16 }
  0x56   : > { %505 = vmatmul.f32.vlgmr.msra.gmra.mxu2 %v441_v17  ;;  %517 = vmatmul.f32.vlgmr.msra.gmra.mxu3 %v445_v18 }
  0x57   : > { %480 = vmatpush.msra.mxu0 %v449_v16  ;;  %1309 = vmatpush.msra.mxu1 %v449_v16 }
  0x58   : > { %481 = vmatmul.f32.vlgmr.msra.gmra.mxu0 %v433_v19  ;;  %493 = vmatmul.f32.vlgmr.msra.gmra.mxu1 %v437_v20 }
  0x5e   : > { %508 = vmatmul.f32.gmra.mxu2 %v442_v21  ;;  %520 = vmatmul.f32.gmra.mxu3 %v446_v22 }
  0x60   : > { %484 = vmatmul.f32.gmra.mxu0 %v434_v23  ;;  %496 = vmatmul.f32.gmra.mxu1 %v438_v24 }
  0x66   : > { %511 = vmatmul.f32.gmra.mxu2 %v443_v25  ;;  %523 = vmatmul.f32.gmra.mxu3 %v447_v26 }
  0x68   : > { %487 = vmatmul.f32.gmra.mxu0 %v435_v27  ;;  %499 = vmatmul.f32.gmra.mxu1 %v439_v28 }
  0x6e   : > { %514 = vmatmul.f32.gmra.mxu2 %v444_v29  ;;  %526 = vmatmul.f32.gmra.mxu3 %v448_v30 }
  0x70   : > { %490 = vmatmul.f32.gmra.mxu0 %v436_v31  ;;  %502 = vmatmul.f32.gmra.mxu1 %v440_v32 }
  0xd5   : > { %v482_v35 = vpop.f32.mrf.mxu0  ;;  %v494_v36 = vpop.f32.mrf.mxu1 }
  0xd6   : > { %v530_v37 = vadd.f32 %v482_v35, %v417_v33  ;;  %v534_v38 = vadd.f32 %v494_v36, %v421_v34 }
  0xd8   : > { %547 = vst.msk [vmem:[#allocation2] sm:$0xff] %vm400_vm0, %v530_v37 }
  0xd9   : > { %551 = vst.msk [vmem:[#allocation2 + $0x20] sm:$0xff] %vm400_vm0, %v534_v38  ;;  %v506_v41 = vpop.f32.mrf.mxu2  ;;  %v518_v42 = vpop.f32.mrf.mxu3 }
  0xda   : > { %v538_v43 = vadd.f32 %v506_v41, %v425_v39  ;;  %v542_v44 = vadd.f32 %v518_v42, %v429_v40 }
  0xdc   : > { %555 = vst.msk [vmem:[#allocation2 + $0x40] sm:$0xff] %vm400_vm0, %v538_v43 }
  0xdd   : > { %559 = vst.msk [vmem:[#allocation2 + $0x60] sm:$0xff] %vm400_vm0, %v542_v44  ;;  %v485_v47 = vpop.f32.mrf.mxu0  ;;  %v497_v48 = vpop.f32.mrf.mxu1 }
  0xde   : > { %v531_v49 = vadd.f32 %v485_v47, %v418_v45  ;;  %v535_v50 = vadd.f32 %v497_v48, %v422_v46 }
  0xe0   : > { %548 = vst.msk [vmem:[#allocation2 + $0x8] sm:$0xff] %vm400_vm0, %v531_v49 }
  0xe1   : > { %552 = vst.msk [vmem:[#allocation2 + $0x28] sm:$0xff] %vm400_vm0, %v535_v50  ;;  %v509_v53 = vpop.f32.mrf.mxu2  ;;  %v521_v54 = vpop.f32.mrf.mxu3 }
  0xe2   : > { %v539_v55 = vadd.f32 %v509_v53, %v426_v51  ;;  %v543_v56 = vadd.f32 %v521_v54, %v430_v52 }
  0xe4   : > { %556 = vst.msk [vmem:[#allocation2 + $0x48] sm:$0xff] %vm400_vm0, %v539_v55 }
  0xe5   : > { %560 = vst.msk [vmem:[#allocation2 + $0x68] sm:$0xff] %vm400_vm0, %v543_v56  ;;  %v488_v59 = vpop.f32.mrf.mxu0  ;;  %v500_v60 = vpop.f32.mrf.mxu1 }
  0xe6   : > { %v532_v61 = vadd.f32 %v488_v59, %v419_v57  ;;  %v536_v62 = vadd.f32 %v500_v60, %v423_v58 }
  0xe8   : > { %549 = vst.msk [vmem:[#allocation2 + $0x10] sm:$0xff] %vm400_vm0, %v532_v61 }
  0xe9   : > { %553 = vst.msk [vmem:[#allocation2 + $0x30] sm:$0xff] %vm400_vm0, %v536_v62  ;;  %v512_v1 = vpop.f32.mrf.mxu2  ;;  %v524_v2 = vpop.f32.mrf.mxu3 }
  0xea   : > { %v540_v3 = vadd.f32 %v512_v1, %v427_v63  ;;  %v544_v4 = vadd.f32 %v524_v2, %v431_v0 }
  0xec   : > { %557 = vst.msk [vmem:[#allocation2 + $0x50] sm:$0xff] %vm400_vm0, %v540_v3 }
  0xed   : > { %561 = vst.msk [vmem:[#allocation2 + $0x70] sm:$0xff] %vm400_vm0, %v544_v4  ;;  %v491_v7 = vpop.f32.mrf.mxu0  ;;  %v503_v8 = vpop.f32.mrf.mxu1 }
  0xee   : > { %v533_v9 = vadd.f32 %v491_v7, %v420_v5  ;;  %v537_v10 = vadd.f32 %v503_v8, %v424_v6 }
  0xf0   : > { %550 = vst.msk [vmem:[#allocation2 + $0x18] sm:$0xff] %vm400_vm0, %v533_v9 }
  0xf1   : > { %554 = vst.msk [vmem:[#allocation2 + $0x38] sm:$0xff] %vm400_vm0, %v537_v10  ;;  %v515_v13 = vpop.f32.mrf.mxu2  ;;  %v527_v14 = vpop.f32.mrf.mxu3  ;;  %567 = sbr.rel (!%p563_p8) target bundleno = 572 (0x23c), region = 56 }
  0xf2   : > { %v541_v15 = vadd.f32 %v515_v13, %v428_v11  ;;  %v545_v16 = vadd.f32 %v527_v14, %v432_v12 }
  0xf4   : > { %558 = vst.msk [vmem:[#allocation2 + $0x58] sm:$0xff] %vm400_vm0, %v541_v15 }
  0xf5   : > { %562 = vst.msk [vmem:[#allocation2 + $0x78] sm:$0xff] %vm400_vm0, %v545_v16 }
  0xf6   : > { %v1852_v17 = vld [vmem:[%s1777_s4 + $0x10] sm:$0xff]  ;;  %s1579_s16 = smov 16   ;;  %v1857_v18 = vld [vmem:[%s1777_s4] sm:$0xff]  ;;  %v1867_v20 = vld [vmem:[%s1777_s4 + $0x18] sm:$0xff]  ;;  %vm988_vm1 = vcmask 130048  }
  0xf7   : > { %672 = vrot.lane.b32.xlu1 %v1852_v17, %s1579_s16  ;;  %668 = vrot.lane.b32.xlu0 %v1857_v18, %s1579_s16  ;;  %v1862_v19 = vld [vmem:[%s1777_s4 + $0x20] sm:$0xff]  ;;  %v1870_v21 = vld [vmem:[%s1777_s4 + $0x8] sm:$0xff]  ;;  %v570_v48 = vld [vmem:[#allocation2 + $0x10] sm:$0xff] }
  0xf8   : > { %676 = vrot.lane.b32.xlu2 %v1862_v19, %s1579_s16  ;;  %v1877_v22 = vld [vmem:[%s1777_s4 + $0x28] sm:$0xff]  ;;  %v1882_v23 = vld [vmem:[%s1777_s4 + $0x38] sm:$0xff]  ;;  %v1885_v24 = vld [vmem:[%s1777_s4 + $0x30] sm:$0xff] }
  0xf9   : > { %v1892_v25 = vld [vmem:[%s1777_s4 + $0x40] sm:$0xff]  ;;  %v1897_v26 = vld [vmem:[%s1777_s4 + $0x50] sm:$0xff]  ;;  %v1900_v27 = vld [vmem:[%s1777_s4 + $0x48] sm:$0xff] }
  0xfa   : > { %v1907_v28 = vld [vmem:[%s1777_s4 + $0x58] sm:$0xff]  ;;  %v1912_v29 = vld [vmem:[%s1777_s4 + $0x68] sm:$0xff]  ;;  %v1915_v30 = vld [vmem:[%s1777_s4 + $0x60] sm:$0xff] }
  0xfb   : > { %v1922_v31 = vld [vmem:[%s1777_s4 + $0x70] sm:$0xff]  ;;  %v1930_v33 = vld [vmem:[%s1777_s4 + $0x78] sm:$0xff]  ;;  %v1937_v34 = vld [vmem:[%s1772_s24] sm:$0xff]  ;;  %s1580_s4 = smov 112  }
  0xfc   : > { %v1927_v32 = vld [vmem:[%s1772_s24 + $0x10] sm:$0xff]  ;;  %v1942_v35 = vld [vmem:[%s1772_s24 + $0x28] sm:$0xff]  ;;  %v1952_v37 = vld [vmem:[%s1772_s24 + $0x18] sm:$0xff] }
  0xfd   : > { %v1945_v36 = vld [vmem:[%s1772_s24 + $0x8] sm:$0xff]  ;;  %v1957_v38 = vld [vmem:[%s1772_s24 + $0x40] sm:$0xff]  ;;  %v1967_v40 = vld [vmem:[%s1772_s24 + $0x30] sm:$0xff] }
  0xfe   : > { %v1960_v39 = vld [vmem:[%s1772_s24 + $0x20] sm:$0xff]  ;;  %v1972_v41 = vld [vmem:[%s1772_s24 + $0x58] sm:$0xff]  ;;  %v1982_v43 = vld [vmem:[%s1772_s24 + $0x48] sm:$0xff] }
  0xff   : > { %674 = vrot.lane.b32.xlu1 %v1867_v20, %s1579_s16  ;;  %670 = vrot.lane.b32.xlu0 %v1870_v21, %s1579_s16  ;;  %v1975_v42 = vld [vmem:[%s1772_s24 + $0x38] sm:$0xff]  ;;  %v1987_v44 = vld [vmem:[%s1772_s24 + $0x50] sm:$0xff]  ;;  %v568_v49 = vld [vmem:[#allocation2] sm:$0xff] }
 0x100   : > { %678 = vrot.lane.b32.xlu2 %v1877_v22, %s1579_s16  ;;  %v1992_v45 = vld [vmem:[%s1772_s24 + $0x60] sm:$0xff]  ;;  %v573_v53 = vld [vmem:[#allocation2 + $0x28] sm:$0xff]  ;;  %v571_v57 = vld [vmem:[#allocation2 + $0x18] sm:$0xff] }
 0x101   : > { %v1997_v47 = vld [vmem:[%s1755_s17] ss:$0 sm:$0xff]  ;;  %v569_v59 = vld [vmem:[#allocation2 + $0x8] sm:$0xff]  ;;  %v574_v6 = vld [vmem:[#allocation2 + $0x30] sm:$0xff] }
 0x102   : > { %v2000_v50 = vadd.f32 %v1997_v47, %v570_v48  ;;  %v2003_v51 = vadd.f32 %v1997_v47, %v568_v49  ;;  %v2008_v60 = vadd.f32 %v1997_v47, %v573_v53  ;;  %v2013_v61 = vadd.f32 %v1997_v47, %v571_v57  ;;  %v576_v0 = vld [vmem:[#allocation2 + $0x40] sm:$0xff]  ;;  %v579_v12 = vld [vmem:[#allocation2 + $0x58] sm:$0xff] }
 0x103   : > { %v2016_v62 = vadd.f32 %v1997_v47, %v569_v59  ;;  %v572_v7 = vld [vmem:[#allocation2 + $0x20] sm:$0xff]  ;;  %v2022_v8 = vadd.f32 %v1997_v47, %v576_v0  ;;  %v2028_v9 = vadd.f32 %v1997_v47, %v574_v6  ;;  %v575_v13 = vld [vmem:[#allocation2 + $0x38] sm:$0xff]  ;;  %v2037_v53 = vadd.f32 %v1997_v47, %v579_v12 }
 0x104   : > { %v2031_v10 = vadd.f32 %v1997_v47, %v572_v7  ;;  %v580_v0 = vld [vmem:[#allocation2 + $0x60] sm:$0xff] }
 0x107   : > { %682 = vrot.lane.b32.xlu1 %v1882_v23, %s1579_s16  ;;  %680 = vrot.lane.b32.xlu0 %v1885_v24, %s1579_s16 }
 0x108   : > { %684 = vrot.lane.b32.xlu2 %v1892_v25, %s1579_s16 }
 0x10f   : > { %688 = vrot.lane.b32.xlu1 %v1897_v26, %s1579_s16  ;;  %686 = vrot.lane.b32.xlu0 %v1900_v27, %s1579_s16 }
 0x110   : > { %690 = vrot.lane.b32.xlu2 %v1907_v28, %s1579_s16 }
 0x117   : > { %694 = vrot.lane.b32.xlu1 %v1912_v29, %s1579_s16  ;;  %692 = vrot.lane.b32.xlu0 %v1915_v30, %s1579_s16 }
 0x118   : > { %696 = vrot.lane.b32.xlu2 %v1922_v31, %s1579_s16 }
 0x11f   : > { %832 = vrot.lane.b32.xlu1 %v1927_v32, %s1579_s16  ;;  %698 = vrot.lane.b32.xlu0 %v1930_v33, %s1579_s16 }
 0x120   : > { %828 = vrot.lane.b32.xlu2 %v1937_v34, %s1579_s16 }
 0x127   : > { %838 = vrot.lane.b32.xlu1 %v1942_v35, %s1579_s16  ;;  %830 = vrot.lane.b32.xlu0 %v1945_v36, %s1579_s16 }
 0x128   : > { %834 = vrot.lane.b32.xlu2 %v1952_v37, %s1579_s16 }
 0x12f   : > { %844 = vrot.lane.b32.xlu1 %v1957_v38, %s1579_s16  ;;  %836 = vrot.lane.b32.xlu0 %v1960_v39, %s1579_s16 }
 0x130   : > { %840 = vrot.lane.b32.xlu2 %v1967_v40, %s1579_s16 }
 0x137   : > { %850 = vrot.lane.b32.xlu1 %v1972_v41, %s1579_s16  ;;  %842 = vrot.lane.b32.xlu0 %v1975_v42, %s1579_s16 }
 0x138   : > { %846 = vrot.lane.b32.xlu2 %v1982_v43, %s1579_s16 }
 0x13f   : > { %848 = vrot.lane.b32.xlu0 %v1987_v44, %s1579_s16 }
 0x140   : > { %852 = vrot.lane.b32.xlu2 %v1992_v45, %s1579_s16 }
 0x152   : > { %v677_v46 = vpop.permute.xlu2 %676 }
 0x153   : > { %v720_v16 = vmul.f32 %v677_v46, %v2031_v10 }
 0x15a   : > { %v679_v52 = vpop.permute.xlu2 %678 }
 0x15b   : > { %v721_v63 = vmul.f32 %v679_v52, %v2008_v60  ;;  %v577_v52 = vld [vmem:[#allocation2 + $0x48] sm:$0xff] }
 0x162   : > { %v685_v2 = vpop.permute.xlu2 %684 }
 0x163   : > { %v724_v11 = vmul.f32 %v685_v2, %v2022_v8 }
 0x169   : > { %v673_v54 = vpop.permute.xlu1 %672  ;;  %v669_v56 = vpop.permute.xlu0 %668 }
 0x16a   : > { %v718_v55 = vmul.f32 %v673_v54, %v2000_v50  ;;  %v716_v58 = vmul.f32 %v669_v56, %v2003_v51  ;;  %v691_v49 = vpop.permute.xlu2 %690  ;;  %v2041_v54 = vadd.f32 %v1997_v47, %v575_v13  ;;  %v582_v56 = vld [vmem:[#allocation2 + $0x70] sm:$0xff] }
 0x16b   : > { %v727_v46 = vmul.f32 %v691_v49, %v2037_v53 }
 0x16c   : > { %752 = vrot.lane.b32.xlu0 %v718_v55, %s1580_s4  ;;  %748 = vrot.lane.b32.xlu1 %v716_v58, %s1580_s4  ;;  %v2046_v55 = vadd.f32 %v1997_v47, %v577_v52  ;;  %v578_v58 = vld [vmem:[#allocation2 + $0x50] sm:$0xff]  ;;  %v2077_v52 = vld [vmem:[%s1772_s24 + $0x68] sm:$0xff] }
 0x171   : > { %v675_v1 = vpop.permute.xlu1 %674  ;;  %v671_v4 = vpop.permute.xlu0 %670 }
 0x172   : > { %v719_v3 = vmul.f32 %v675_v1, %v2013_v61  ;;  %v717_v5 = vmul.f32 %v671_v4, %v2016_v62  ;;  %v2052_v1 = vadd.f32 %v1997_v47, %v582_v56  ;;  %v697_v4 = vpop.permute.xlu2 %696 }
 0x174   : > { %758 = vrot.lane.b32.xlu0 %v721_v63, %s1580_s4  ;;  %750 = vrot.lane.b32.xlu2 %v717_v5, %s1580_s4  ;;  %v2061_v5 = vadd.f32 %v1997_v47, %v580_v0  ;;  %v730_v6 = vmul.f32 %v697_v4, %v2052_v1  ;;  %v893_v0 = vmul.f32 %v1870_v21, %v2016_v62 }
 0x175   : > { %754 = vrot.lane.b32.xlu1 %v719_v3, %s1580_s4  ;;  %v2056_v3 = vadd.f32 %v1997_v47, %v578_v58  ;;  %v2087_v58 = vld [vmem:[%s1772_s24 + $0x78] sm:$0xff]  ;;  %v898_v4 = vmul.f32 %v1885_v24, %v2028_v9  ;;  %v901_v21 = vmul.f32 %v1900_v27, %v2046_v55  ;;  %v900_v24 = vmul.f32 %v1892_v25, %v2022_v8 }
 0x176   : > { %2399 = vst [vmem:[#allocation11_spill] sm:$0xff] %v2087_v58  ;;  %v904_v27 = vmul.f32 %v1915_v30, %v2061_v5  ;;  %v903_v25 = vmul.f32 %v1907_v28, %v2037_v53 }
 0x179   : > { %v681_v14 = vpop.permute.xlu0 %680  ;;  %v683_v15 = vpop.permute.xlu1 %682 }
 0x17a   : > { %v722_v48 = vmul.f32 %v681_v14, %v2028_v9  ;;  %v723_v57 = vmul.f32 %v683_v15, %v2041_v54  ;;  %v583_v14 = vld [vmem:[#allocation2 + $0x78] sm:$0xff] }
 0x17c   : > { %764 = vrot.lane.b32.xlu0 %v724_v11, %s1580_s4  ;;  %756 = vrot.lane.b32.xlu2 %v720_v16, %s1580_s4  ;;  %v581_v11 = vld [vmem:[#allocation2 + $0x68] sm:$0xff] }
 0x17d   : > { %760 = vrot.lane.b32.xlu1 %v722_v48, %s1580_s4  ;;  %v2068_v15 = vadd.f32 %v1997_v47, %v581_v11  ;;  %v2073_v48 = vadd.f32 %v1997_v47, %v583_v14  ;;  %v2090_v47 = vld [vmem:[%s1772_s24 + $0x70] sm:$0xff] }
 0x17f   : > { %2397 = vst [vmem:[#allocation9_spill] sm:$0xff] %v2068_v15  ;;  %v905_v30 = vmul.f32 %v1912_v29, %v2068_v15 }
 0x180   : > { %2398 = vst [vmem:[#allocation10_spill] sm:$0xff] %v2073_v48 }
 0x181   : > { %v687_v59 = vpop.permute.xlu0 %686  ;;  %v689_v2 = vpop.permute.xlu1 %688 }
 0x182   : > { %v725_v63 = vmul.f32 %v687_v59, %v2046_v55  ;;  %v726_v7 = vmul.f32 %v689_v2, %v2056_v3  ;;  %v2097_v59 = vpop.permute.xlu2 %828 }
 0x184   : > { %770 = vrot.lane.b32.xlu0 %v727_v46, %s1580_s4  ;;  %762 = vrot.lane.b32.xlu2 %v723_v57, %s1580_s4  ;;  %v892_v57 = vmul.f32 %v1857_v18, %v2003_v51  ;;  %v894_v18 = vmul.f32 %v1852_v17, %v2000_v50  ;;  %v897_v17 = vmul.f32 %v1877_v22, %v2008_v60 }
 0x185   : > { %766 = vrot.lane.b32.xlu1 %v725_v63, %s1580_s4  ;;  %v895_v63 = vmul.f32 %v1867_v20, %v2013_v61  ;;  %v896_v20 = vmul.f32 %v1862_v19, %v2031_v10 }
 0x189   : > { %v693_v12 = vpop.permute.xlu0 %692  ;;  %v695_v16 = vpop.permute.xlu1 %694 }
 0x18a   : > { %v728_v13 = vmul.f32 %v693_v12, %v2061_v5  ;;  %v729_v49 = vmul.f32 %v695_v16, %v2068_v15  ;;  %v2108_v2 = vpop.permute.xlu2 %834  ;;  %v907_v12 = vmul.f32 %v1930_v33, %v2073_v48 }
 0x18c   : > { %776 = vrot.lane.b32.xlu0 %v730_v6, %s1580_s4  ;;  %768 = vrot.lane.b32.xlu2 %v726_v7, %s1580_s4  ;;  %v899_v6 = vmul.f32 %v1882_v23, %v2041_v54  ;;  %v902_v23 = vmul.f32 %v1897_v26, %v2056_v3  ;;  %v906_v26 = vmul.f32 %v1922_v31, %v2052_v1 }
 0x18d   : > { %772 = vrot.lane.b32.xlu1 %v728_v13, %s1580_s4 }
 0x191   : > { %v699_v46 = vpop.permute.xlu0 %698  ;;  %v833_v22 = vpop.permute.xlu1 %832 }
 0x192   : > { %v731_v56 = vmul.f32 %v699_v46, %v2073_v48  ;;  %v2125_v7 = vpop.permute.xlu2 %840 }
 0x194   : > { %854 = vrot.lane.b32.xlu0 %v2077_v52, %s1579_s16  ;;  %774 = vrot.lane.b32.xlu2 %v729_v49, %s1580_s4 }
 0x195   : > { %778 = vrot.lane.b32.xlu1 %v731_v56, %s1580_s4 }
 0x199   : > { %v2130_v19 = vpop.permute.xlu0 %830  ;;  %v839_v28 = vpop.permute.xlu1 %838 }
 0x19a   : > { %v2138_v11 = vpop.permute.xlu2 %846 }
 0x19c   : > { %924 = vrot.lane.b32.xlu0 %v892_v57, %s1579_s16  ;;  %858 = vrot.lane.b32.xlu2 %v2087_v58, %s1579_s16 }
 0x19d   : > { %856 = vrot.lane.b32.xlu1 %v2090_v47, %s1579_s16 }
 0x1a1   : > { %v2145_v13 = vpop.permute.xlu0 %836  ;;  %v845_v33 = vpop.permute.xlu1 %844 }
 0x1a2   : > { %v2154_v14 = vpop.permute.xlu2 %852 }
 0x1a4   : > { %930 = vrot.lane.b32.xlu0 %v895_v63, %s1579_s16  ;;  %928 = vrot.lane.b32.xlu2 %v894_v18, %s1579_s16 }
 0x1a5   : > { %926 = vrot.lane.b32.xlu1 %v893_v0, %s1579_s16 }
 0x1a9   : > { %v2156_v16 = vpop.permute.xlu0 %842  ;;  %v851_v29 = vpop.permute.xlu1 %850 }
 0x1ac   : > { %936 = vrot.lane.b32.xlu0 %v898_v4, %s1579_s16  ;;  %934 = vrot.lane.b32.xlu2 %v897_v17, %s1579_s16 }
 0x1ad   : > { %932 = vrot.lane.b32.xlu1 %v896_v20, %s1579_s16  ;;  %v2170_v20 = vmul.f32 %v2077_v52, %v2068_v15  ;;  %v878_v52 = vmul.f32 %v833_v22, %v2000_v50 }
 0x1af   : > { %2401 = vst [vmem:[#allocation13_spill] sm:$0xff] %v2170_v20 }
 0x1b1   : > { %v2160_v46 = vpop.permute.xlu0 %848 }
 0x1b4   : > { %942 = vrot.lane.b32.xlu0 %v901_v21, %s1579_s16  ;;  %940 = vrot.lane.b32.xlu2 %v900_v24, %s1579_s16 }
 0x1b5   : > { %938 = vrot.lane.b32.xlu1 %v899_v6, %s1579_s16 }
 0x1bc   : > { %948 = vrot.lane.b32.xlu0 %v904_v27, %s1579_s16  ;;  %946 = vrot.lane.b32.xlu2 %v903_v25, %s1579_s16 }
 0x1bd   : > { %944 = vrot.lane.b32.xlu1 %v902_v23, %s1579_s16 }
 0x1c4   : > { %954 = vrot.lane.b32.xlu0 %v907_v12, %s1579_s16  ;;  %952 = vrot.lane.b32.xlu2 %v906_v26, %s1579_s16  ;;  %v638_v12 = vmul.f32 %v1927_v32, %v2000_v50  ;;  %v881_v32 = vmul.f32 %v839_v28, %v2008_v60 }
 0x1c5   : > { %950 = vrot.lane.b32.xlu1 %v905_v30, %s1579_s16 }
 0x1ce   : > { %v2158_v49 = vpop.permute.xlu2 %750 }
 0x1d6   : > { %v2162_v56 = vpop.permute.xlu2 %756 }
 0x1de   : > { %v753_v31 = vpop.permute.xlu0 %752  ;;  %v2164_v57 = vpop.permute.xlu2 %762 }
 0x1df   : > { %v749_v63 = vpop.permute.xlu1 %748  ;;  %v798_v58 = vsub.f32 %v638_v12, %v753_v31 }
 0x1e6   : > { %v759_v18 = vpop.permute.xlu0 %758  ;;  %v2166_v0 = vpop.permute.xlu2 %768 }
 0x1e7   : > { %2400 = vst [vmem:[#allocation12_spill] sm:$0xff] %v2166_v0  ;;  %v755_v4 = vpop.permute.xlu1 %754 }
 0x1ee   : > { %v765_v17 = vpop.permute.xlu0 %764  ;;  %v2172_v21 = vpop.permute.xlu2 %774 }
 0x1ef   : > { %2402 = vst [vmem:[#allocation14_spill] sm:$0xff] %v2172_v21  ;;  %v2174_v6 = vpop.permute.xlu1 %760  ;;  %v641_v21 = vmul.f32 %v1942_v35, %v2008_v60  ;;  %v644_v35 = vmul.f32 %v1957_v38, %v2022_v8  ;;  %v876_v60 = vmul.f32 %v2097_v59, %v2003_v51  ;;  %v639_v38 = vmul.f32 %v1952_v37, %v2013_v61 }
 0x1f0   : > { %v879_v59 = vmul.f32 %v2108_v2, %v2013_v61  ;;  %v640_v2 = vmul.f32 %v1960_v39, %v2031_v10 }
 0x1f1   : > { %v799_v37 = vsub.f32 %v639_v38, %v755_v4 }
 0x1f6   : > { %v771_v27 = vpop.permute.xlu0 %770  ;;  %v2178_v23 = vpop.permute.xlu2 %858 }
 0x1f7   : > { %2403 = vst [vmem:[#allocation15_spill] sm:$0xff] %v2178_v23  ;;  %v2180_v25 = vpop.permute.xlu1 %766  ;;  %v801_v23 = vsub.f32 %v641_v21, %v759_v18 }
 0x1fe   : > { %v2185_v30 = vpop.permute.xlu0 %776  ;;  %v929_v26 = vpop.permute.xlu2 %928 }
 0x1ff   : > { %v2187_v15 = vpop.permute.xlu1 %772  ;;  %v974_v48 = vadd.f32 %v929_v26, %v878_v52 }
 0x201   : > { %v991_v24 = vsel %vm988_vm1, %v798_v58, %v974_v48  ;;  %v636_v48 = vmul.f32 %v1937_v34, %v2003_v51  ;;  %v884_v58 = vmul.f32 %v845_v33, %v2022_v8  ;;  %v637_v51 = vmul.f32 %v1945_v36, %v2016_v62 }
 0x202   : > { %1007 = vst.msk [vmem:[%s1784_s5 + $0x10] sm:$0xff] %vm400_vm0, %v991_v24  ;;  %v647_v8 = vmul.f32 %v1972_v41, %v2037_v53  ;;  %v877_v33 = vmul.f32 %v2130_v19, %v2016_v62  ;;  %v650_v19 = vmul.f32 %v2090_v47, %v2052_v1  ;;  %v800_v47 = vsub.f32 %v640_v2, %v2162_v56 }
 0x203   : > { %v796_v18 = vsub.f32 %v636_v48, %v749_v63  ;;  %v887_v63 = vmul.f32 %v851_v29, %v2037_v53  ;;  %v797_v36 = vsub.f32 %v637_v51, %v2158_v49  ;;  %v642_v53 = vmul.f32 %v1967_v40, %v2028_v9  ;;  %v2404_v51 = vld [vmem:[#allocation12_spill] sm:$0xff] }
 0x204   : > { %v882_v49 = vmul.f32 %v2125_v7, %v2028_v9  ;;  %v880_v29 = vmul.f32 %v2145_v13, %v2031_v10  ;;  %v645_v7 = vmul.f32 %v1982_v43, %v2046_v55  ;;  %v643_v13 = vmul.f32 %v1975_v42, %v2041_v54 }
 0x205   : > { %v885_v56 = vmul.f32 %v2138_v11, %v2046_v55  ;;  %v648_v55 = vmul.f32 %v1992_v45, %v2061_v5  ;;  %v888_v11 = vmul.f32 %v2154_v14, %v2061_v5  ;;  %v2405_v5 = vld [vmem:[#allocation10_spill] sm:$0xff]  ;;  %v2406_v14 = vld [vmem:[#allocation11_spill] sm:$0xff] }
 0x206   : > { %v2195_v20 = vpop.permute.xlu0 %854  ;;  %v935_v50 = vpop.permute.xlu2 %934  ;;  %v803_v43 = vsub.f32 %v643_v13, %v2164_v57 }
 0x207   : > { %v2197_v22 = vpop.permute.xlu1 %778  ;;  %v977_v0 = vadd.f32 %v935_v50, %v881_v32 }
 0x209   : > { %v994_v31 = vsel %vm988_vm1, %v801_v23, %v977_v0  ;;  %v804_v0 = vsub.f32 %v644_v35, %v765_v17 }
 0x20a   : > { %1010 = vst.msk [vmem:[%s1784_s5 + $0x28] sm:$0xff] %vm400_vm0, %v994_v31  ;;  %v807_v31 = vsub.f32 %v647_v8, %v771_v27  ;;  %v802_v27 = vsub.f32 %v642_v53, %v2174_v6  ;;  %v883_v6 = vmul.f32 %v2156_v16, %v2041_v54  ;;  %v646_v54 = vmul.f32 %v1987_v44, %v2056_v3 }
 0x20b   : > { %v886_v16 = vmul.f32 %v2160_v46, %v2056_v3  ;;  %v2407_v3 = vld [vmem:[#allocation15_spill] sm:$0xff]  ;;  %v2408_v46 = vld [vmem:[#allocation9_spill] sm:$0xff] }
 0x20c   : > { %v806_v8 = vsub.f32 %v646_v54, %v2404_v51 }
 0x20e   : > { %v925_v28 = vpop.permute.xlu0 %924  ;;  %v941_v21 = vpop.permute.xlu2 %940 }
 0x20f   : > { %v972_v24 = vadd.f32 %v925_v28, %v876_v60  ;;  %v857_v12 = vpop.permute.xlu1 %856  ;;  %v980_v23 = vadd.f32 %v941_v21, %v884_v58  ;;  %v810_v28 = vsub.f32 %v650_v19, %v2185_v30 }
 0x210   : > { %v890_v40 = vmul.f32 %v857_v12, %v2052_v1 }
 0x211   : > { %v989_v34 = vsel %vm988_vm1, %v796_v18, %v972_v24  ;;  %v997_v52 = vsel %vm988_vm1, %v804_v0, %v980_v23  ;;  %v805_v24 = vsub.f32 %v645_v7, %v2180_v25  ;;  %v808_v25 = vsub.f32 %v648_v55, %v2187_v15 }
 0x212   : > { %1005 = vst.msk [vmem:[%s1784_s5] sm:$0xff] %vm400_vm0, %v989_v34  ;;  %v891_v15 = vmul.f32 %v2407_v3, %v2405_v5 }
 0x213   : > { %1013 = vst.msk [vmem:[%s1784_s5 + $0x40] sm:$0xff] %vm400_vm0, %v997_v52 }
 0x216   : > { %v931_v17 = vpop.permute.xlu0 %930  ;;  %v947_v26 = vpop.permute.xlu2 %946 }
 0x217   : > { %v975_v32 = vadd.f32 %v931_v17, %v879_v59  ;;  %v927_v50 = vpop.permute.xlu1 %926  ;;  %v983_v48 = vadd.f32 %v947_v26, %v887_v63  ;;  %v889_v63 = vmul.f32 %v2195_v20, %v2408_v46 }
 0x218   : > { %v973_v41 = vadd.f32 %v927_v50, %v877_v33  ;;  %v651_v33 = vmul.f32 %v2406_v14, %v2405_v5 }
 0x219   : > { %v992_v35 = vsel %vm988_vm1, %v799_v37, %v975_v32  ;;  %v1000_v61 = vsel %vm988_vm1, %v807_v31, %v983_v48  ;;  %v2409_v31 = vld [vmem:[#allocation13_spill] sm:$0xff]  ;;  %v2410_v48 = vld [vmem:[#allocation14_spill] sm:$0xff] }
 0x21a   : > { %1008 = vst.msk [vmem:[%s1784_s5 + $0x18] sm:$0xff] %vm400_vm0, %v992_v35  ;;  %v990_v62 = vsel %vm988_vm1, %v797_v36, %v973_v41  ;;  %v811_v37 = vsub.f32 %v651_v33, %v2197_v22  ;;  %v2411_v41 = vsub.f32 %v2409_v31, %v2410_v48 }
 0x21b   : > { %1016 = vst.msk [vmem:[%s1784_s5 + $0x58] sm:$0xff] %vm400_vm0, %v1000_v61 }
 0x21c   : > { %1006 = vst.msk [vmem:[%s1784_s5 + $0x8] sm:$0xff] %vm400_vm0, %v990_v62 }
 0x21e   : > { %v937_v4 = vpop.permute.xlu0 %936  ;;  %v953_v39 = vpop.permute.xlu2 %952 }
 0x21f   : > { %v978_v60 = vadd.f32 %v937_v4, %v882_v49  ;;  %v933_v58 = vpop.permute.xlu1 %932  ;;  %v986_v18 = vadd.f32 %v953_v39, %v890_v40 }
 0x220   : > { %v976_v21 = vadd.f32 %v933_v58, %v880_v29 }
 0x221   : > { %v995_v9 = vsel %vm988_vm1, %v802_v27, %v978_v60  ;;  %v1003_v10 = vsel %vm988_vm1, %v810_v28, %v986_v18 }
 0x222   : > { %1011 = vst.msk [vmem:[%s1784_s5 + $0x30] sm:$0xff] %vm400_vm0, %v995_v9  ;;  %v993_v1 = vsel %vm988_vm1, %v800_v47, %v976_v21 }
 0x223   : > { %1019 = vst.msk [vmem:[%s1784_s5 + $0x70] sm:$0xff] %vm400_vm0, %v1003_v10 }
 0x224   : > { %1009 = vst.msk [vmem:[%s1784_s5 + $0x20] sm:$0xff] %vm400_vm0, %v993_v1 }
 0x226   : > { %v943_v30 = vpop.permute.xlu0 %942 }
 0x227   : > { %v981_v12 = vadd.f32 %v943_v30, %v885_v56  ;;  %v939_v0 = vpop.permute.xlu1 %938 }
 0x228   : > { %v979_v23 = vadd.f32 %v939_v0, %v883_v6 }
 0x229   : > { %v998_v34 = vsel %vm988_vm1, %v805_v24, %v981_v12 }
 0x22a   : > { %1014 = vst.msk [vmem:[%s1784_s5 + $0x48] sm:$0xff] %vm400_vm0, %v998_v34  ;;  %v996_v42 = vsel %vm988_vm1, %v803_v43, %v979_v23 }
 0x22b   : > { %1012 = vst.msk [vmem:[%s1784_s5 + $0x38] sm:$0xff] %vm400_vm0, %v996_v42 }
 0x22e   : > { %v949_v57 = vpop.permute.xlu0 %948 }
 0x22f   : > { %v984_v52 = vadd.f32 %v949_v57, %v888_v11  ;;  %v945_v38 = vpop.permute.xlu1 %944 }
 0x230   : > { %v982_v45 = vadd.f32 %v945_v38, %v886_v16 }
 0x231   : > { %v1001_v59 = vsel %vm988_vm1, %v808_v25, %v984_v52 }
 0x232   : > { %1017 = vst.msk [vmem:[%s1784_s5 + $0x60] sm:$0xff] %vm400_vm0, %v1001_v59  ;;  %v999_v44 = vsel %vm988_vm1, %v806_v8, %v982_v45 }
 0x233   : > { %1015 = vst.msk [vmem:[%s1784_s5 + $0x50] sm:$0xff] %vm400_vm0, %v999_v44 }
 0x236   : > { %v955_v17 = vpop.permute.xlu0 %954 }
 0x237   : > { %v987_v26 = vadd.f32 %v955_v17, %v891_v15  ;;  %v951_v32 = vpop.permute.xlu1 %950 }
 0x238   : > { %v985_v50 = vadd.f32 %v951_v32, %v889_v63 }
 0x239   : > { %v1004_v36 = vsel %vm988_vm1, %v811_v37, %v987_v26 }
 0x23a   : > { %1020 = vst.msk [vmem:[%s1784_s5 + $0x78] sm:$0xff] %vm400_vm0, %v1004_v36  ;;  %v1002_v35 = vsel %vm988_vm1, %v2411_v41, %v985_v50 }
 0x23b   : > { %1018 = vst.msk [vmem:[%s1784_s5 + $0x68] sm:$0xff] %vm400_vm0, %v1002_v35 }
 0x23c PF: > { %p1021_p9 = scmp.ge.s32.totalorder %s1562_s25, 8 }
 0x23d   : > { %v1026_v20 = vld [vmem:[#allocation2] sm:$0xff] (%p1021_p9)  ;;  %v1027_v61 = vld [vmem:[#allocation2 + $0x8] sm:$0xff] (%p1021_p9)  ;;  %v1028_v62 = vld [vmem:[#allocation2 + $0x10] sm:$0xff] (%p1021_p9) }
 0x23e   : > { %1025 = sbr.rel (!%p1021_p9) target bundleno = 593 (0x251), region = 60  ;;  %v1419_v22 = vld [vmem:[%s1755_s17] ss:$0 sm:$0xff] (%p1021_p9)  ;;  %v1029_v53 = vld [vmem:[#allocation2 + $0x18] sm:$0xff] (%p1021_p9)  ;;  %v1031_v40 = vld [vmem:[#allocation2 + $0x28] sm:$0xff] (%p1021_p9) }
 0x23f   : > { %v1046_v2 = vadd.f32 (%p1021_p9), %v1419_v22, %v1026_v20  ;;  %v1047_v19 = vadd.f32 (%p1021_p9), %v1419_v22, %v1027_v61  ;;  %v1048_v49 = vadd.f32 (%p1021_p9), %v1419_v22, %v1028_v62  ;;  %v1030_v29 = vld [vmem:[#allocation2 + $0x20] sm:$0xff] (%p1021_p9)  ;;  %v1049_v4 = vadd.f32 (%p1021_p9), %v1419_v22, %v1029_v53  ;;  %v1032_v27 = vld [vmem:[#allocation2 + $0x30] sm:$0xff] (%p1021_p9)  ;;  %v1033_v60 = vld [vmem:[#allocation2 + $0x38] sm:$0xff] (%p1021_p9) }
 0x240   : > { %v1050_v39 = vadd.f32 (%p1021_p9), %v1419_v22, %v1030_v29  ;;  %v1051_v58 = vadd.f32 (%p1021_p9), %v1419_v22, %v1031_v40  ;;  %v1034_v47 = vld [vmem:[#allocation2 + $0x40] sm:$0xff] (%p1021_p9)  ;;  %v1052_v28 = vadd.f32 (%p1021_p9), %v1419_v22, %v1032_v27  ;;  %v1035_v18 = vld [vmem:[#allocation2 + $0x48] sm:$0xff] (%p1021_p9)  ;;  %v1053_v21 = vadd.f32 (%p1021_p9), %v1419_v22, %v1033_v60  ;;  %v1036_v9 = vld [vmem:[#allocation2 + $0x50] sm:$0xff] (%p1021_p9) }
 0x241   : > { %1062 = vst.msk [vmem:[%s1784_s5] sm:$0xff] (%p1021_p9), %vm400_vm0, %v1046_v2  ;;  %v1054_v10 = vadd.f32 (%p1021_p9), %v1419_v22, %v1034_v47  ;;  %v1037_v1 = vld [vmem:[#allocation2 + $0x58] sm:$0xff] (%p1021_p9)  ;;  %v1055_v7 = vadd.f32 (%p1021_p9), %v1419_v22, %v1035_v18  ;;  %v1038_v13 = vld [vmem:[#allocation2 + $0x60] sm:$0xff] (%p1021_p9)  ;;  %v1056_v56 = vadd.f32 (%p1021_p9), %v1419_v22, %v1036_v9  ;;  %v1039_v6 = vld [vmem:[#allocation2 + $0x68] sm:$0xff] (%p1021_p9) }
 0x242   : > { %1063 = vst.msk [vmem:[%s1784_s5 + $0x8] sm:$0xff] (%p1021_p9), %vm400_vm0, %v1047_v19  ;;  %v1057_v30 = vadd.f32 (%p1021_p9), %v1419_v22, %v1037_v1  ;;  %v1040_v24 = vld [vmem:[#allocation2 + $0x70] sm:$0xff] (%p1021_p9)  ;;  %v1058_v12 = vadd.f32 (%p1021_p9), %v1419_v22, %v1038_v13  ;;  %v1041_v0 = vld [vmem:[#allocation2 + $0x78] sm:$0xff] (%p1021_p9)  ;;  %v1059_v43 = vadd.f32 (%p1021_p9), %v1419_v22, %v1039_v6 }
 0x243   : > { %1064 = vst.msk [vmem:[%s1784_s5 + $0x10] sm:$0xff] %vm400_vm0, %v1048_v49  ;;  %v1060_v23 = vadd.f32 %v1419_v22, %v1040_v24  ;;  %v1061_v34 = vadd.f32 %v1419_v22, %v1041_v0 }
 0x244   : > { %1065 = vst.msk [vmem:[%s1784_s5 + $0x18] sm:$0xff] %vm400_vm0, %v1049_v4 }
 0x245   : > { %1066 = vst.msk [vmem:[%s1784_s5 + $0x20] sm:$0xff] %vm400_vm0, %v1050_v39 }
 0x246   : > { %1067 = vst.msk [vmem:[%s1784_s5 + $0x28] sm:$0xff] %vm400_vm0, %v1051_v58 }
 0x247   : > { %1068 = vst.msk [vmem:[%s1784_s5 + $0x30] sm:$0xff] %vm400_vm0, %v1052_v28 }
 0x248   : > { %1069 = vst.msk [vmem:[%s1784_s5 + $0x38] sm:$0xff] %vm400_vm0, %v1053_v21 }
 0x249   : > { %1070 = vst.msk [vmem:[%s1784_s5 + $0x40] sm:$0xff] %vm400_vm0, %v1054_v10 }
 0x24a   : > { %1071 = vst.msk [vmem:[%s1784_s5 + $0x48] sm:$0xff] %vm400_vm0, %v1055_v7 }
 0x24b   : > { %1072 = vst.msk [vmem:[%s1784_s5 + $0x50] sm:$0xff] %vm400_vm0, %v1056_v56 }
 0x24c   : > { %1073 = vst.msk [vmem:[%s1784_s5 + $0x58] sm:$0xff] %vm400_vm0, %v1057_v30 }
 0x24d   : > { %1074 = vst.msk [vmem:[%s1784_s5 + $0x60] sm:$0xff] %vm400_vm0, %v1058_v12 }
 0x24e   : > { %1075 = vst.msk [vmem:[%s1784_s5 + $0x68] sm:$0xff] %vm400_vm0, %v1059_v43 }
 0x24f   : > { %1076 = vst.msk [vmem:[%s1784_s5 + $0x70] sm:$0xff] %vm400_vm0, %v1060_v23 }
 0x250   : > { %1077 = vst.msk [vmem:[%s1784_s5 + $0x78] sm:$0xff] %vm400_vm0, %v1061_v34 }
 0x251 PF: > { %s21_s28 = sadd.s32 1, %s1574_s28   ;;  %s2412_s18 = smov %s1538_s19 }
 0x252   : > { %p18_p10 = scmp.ge.s32.totalorder %s21_s28, 38   ;;  %s2413_s19 = smov %s1542_s20 }
 0x253   : > { %s2414_s20 = smov %s1741_s30  ;;  %s2415_s21 = smov %s1550_s22 }
 0x254   : > { %s2416_s22 = smov %s1554_s23  ;;  %s2417_s23 = smov %s1692_s11 }
 0x255   : > { %s2418_s24 = smov %s1566_s26  ;;  %s2419_s25 = smov %s1570_s27 }
 0x256   : > { %s2420_s26 = smov %s2423_s29  ;;  %s2421_s27 = smov %s2427_s13 }
 0x257   :  { %20 = sbr.rel (!%p18_p10) target bundleno = 13 (0xd), region = 114 }
 0x25c   :  { %1108 = vsyncpa [#allocation4], 1 }
 0x25d   :  { %1110 = vsyncpa [#allocation4 + $0x1], 1 }
 0x25e   :  { %1111 = vsyncpa [#allocation6], 1 }
 0x25f   :  { %1113 = vsyncpa [#allocation6 + $0x1], 1 }

</bundles_post_ra>
